<compile_context>
chip_gen: v6e
topology: v6e:2x2x1
jax: 0.10.0
libtpu: 0.0.40
codegen_flags: <defaults>
</compile_context>

<pallas_src>
import functools

import jax
import jax.numpy as jnp
from jax.experimental import pallas as pl
from jax.experimental.pallas import tpu as pltpu


# ----------------------------- parameter setup ------------------------------

def _he_uniform(key, fan_in, fan_out):
    # 'He uniform' initializer (matches the module's default initializer name).
    limit = jnp.sqrt(6.0 / fan_in)
    return jax.random.uniform(key, (fan_in, fan_out), jnp.float32, -limit, limit)


def init_fnn_params(key, layer_sizes, in_d, out_d):
    """FNN(layer_sizes, activation, in_d, out_d): MLP in_d -> *layer_sizes -> out_d,
    tanh on every layer except the last."""
    dims = [in_d] + list(layer_sizes) + [out_d]
    params = []
    for i in range(len(dims) - 1):
        key, wk = jax.random.split(key)
        w = _he_uniform(wk, dims[i], dims[i + 1])
        b = jnp.zeros((1, dims[i + 1]), jnp.float32)
        params.append((w, b))
    return params


def _fnn_apply(x, params):
    """Plain-JAX MLP (used for the hoisted branch net and for the reference)."""
    n = len(params)
    for i, (w, b) in enumerate(params):
        x = x @ w + b
        if i < n - 1:
            x = jnp.tanh(x)
    return x


# ------------------------------- Pallas kernel -------------------------------

def _deeponet_kernel(nt, in_dt, *refs):
    # refs: yb (B, mid), xt_T tile (in_dt, tn), [w_T (out,in), b_T (out,1)] * nt,
    #       b0 (SMEM scalar), out tile (B, tn)
    yb_ref, xt_ref = refs[0], refs[1]
    idx = 2

    # Trunk MLP, feature-major: activations are (width, tn) -> lane-dense.
    t = xt_ref[...]
    for i in range(nt):
        w_t = refs[idx][...]       # (out, in)
        b_t = refs[idx + 1][...]   # (out, 1)
        idx += 2
        if i == 0 and in_dt <= 4:
            # Tiny contraction dim: do it on the (otherwise idle) VPU as
            # broadcast-FMAs instead of a 2/256-utilized MXU matmul.
            h = w_t[:, 0:1] * t[0:1, :]
            for k in range(1, in_dt):
                h = h + w_t[:, k:k + 1] * t[k:k + 1, :]
            t = h + b_t
        else:
            t = jnp.dot(w_t, t, preferred_element_type=jnp.float32) + b_t
        if i < nt - 1:
            t = jnp.tanh(t)

    b0_ref = refs[idx]
    out_ref = refs[idx + 1]

    # einsum('bi,ni->bn') in MXU-native form: contract yb's last dim against t's
    # second-to-last dim (t is already (mid, tn)) -- no materialized transpose.
    y = jnp.dot(yb_ref[...], t, preferred_element_type=jnp.float32)
    out_ref[...] = y + b0_ref[0]


def _choose_tile(n_pad):
    """Pick a lane-dense trunk tile: as large as possible (<= 4096), multiple of 128,
    dividing n_pad, while keeping >= 2 grid steps when n_pad >= 256 so 'parallel'
    actually feeds both TensorCores on v7x."""
    if n_pad <= 128:
        return n_pad
    cap = min(n_pad // 2, 4096)
    cap = (cap // 128) * 128
    for cand in range(cap, 127, -128):
        if n_pad % cand == 0:
            return cand
    return 128


def deeponet_forward(x_branch, x_trunk, branch_params, trunk_params, b0, *, tn=None):
    """Fused DeepONet forward. Returns (B, N) float32."""
    nt = len(trunk_params)

    B, _ = x_branch.shape
    N, in_dt = x_trunk.shape

    # Branch MLP hoisted out of the kernel (tiny, depends only on x_branch).
    yb = _fnn_apply(x_branch.astype(jnp.float32), branch_params)  # (B, mid_d)

    # Pad N up to a multiple of 128 and go feature-major for the trunk input.
    n_pad = max(128, ((N + 127) // 128) * 128)
    xt_t = jnp.pad(x_trunk.astype(jnp.float32).T, ((0, 0), (0, n_pad - N)))  # (in_dt, n_pad)

    if tn is None:
        tn = _choose_tile(n_pad)
    grid = (n_pad // tn,)

    # Transposed trunk params: W_T is (out, in), bias is (out, 1).
    trunk_t = [(w.T, b.reshape(-1, 1)) for (w, b) in trunk_params]
    flat_trunk = []
    for w_t, b_t in trunk_t:
        flat_trunk.extend([w_t, b_t])

    vmem = pltpu.MemorySpace.VMEM
    smem = pltpu.MemorySpace.SMEM

    def resident(arr):
        # Full-array block with constant index_map: stays resident in VMEM.
        nd = arr.ndim
        return pl.BlockSpec(arr.shape, lambda n: (0,) * nd, memory_space=vmem)

    in_specs = (
        [resident(yb),
         pl.BlockSpec((in_dt, tn), lambda n: (0, n), memory_space=vmem)]
        + [resident(p) for p in flat_trunk]
        + [pl.BlockSpec((1,), lambda n: (0,), memory_space=smem)]  # scalar output bias
    )
    out_specs = pl.BlockSpec((B, tn), lambda n: (0, n), memory_space=vmem)

    # Explicit VMEM sizing only if tiles are pushed very large (per review).
    max_w = max([in_dt] + [w_t.shape[0] for w_t, _ in trunk_t])
    per_step = 4 * tn * (2 * in_dt + 2 * B + 2 * max_w)           # dbl-buffered tiles + activations
    resident_bytes = 4 * (yb.size + sum(p.size for p in flat_trunk))
    est = per_step + resident_bytes
    vmem_limit = int(min(2 * est, 64 * 1024 * 1024)) if est > 16 * 1024 * 1024 else None

    kernel = functools.partial(_deeponet_kernel, nt, in_dt)

    out_pad = pl.pallas_call(
        kernel,
        out_shape=jax.ShapeDtypeStruct((B, n_pad), jnp.float32),
        grid=grid,
        in_specs=in_specs,
        out_specs=out_specs,
        compiler_params=pltpu.CompilerParams(
            dimension_semantics=("parallel",),   # shard N-tiles across TCs on v7x
            vmem_limit_bytes=vmem_limit,
        ),
    )(yb, xt_t, *flat_trunk, b0)

    return out_pad[:, :N]


# ------------------------------ pure-JAX reference ---------------------------

def _ref_deeponet(x_branch, x_trunk, branch_params, trunk_params, b0):
    yb = _fnn_apply(x_branch, branch_params)
    yt = _fnn_apply(x_trunk, trunk_params)
    return jnp.einsum('bi,ni->bn', yb, yt) + b0[0]


# ----------------------------------- main ------------------------------------

if __name__ == "__main__":
    key = jax.random.PRNGKey(0)

    # DeepONet(layer_size_branch=[32,32], layer_size_trunk=[32,32],
    #          activation='tanh', in_d_branch=16, in_d_trunk=2, mid_d=32)
    in_d_branch, in_d_trunk, mid_d = 16, 2, 32
    layer_size_branch = [32, 32]
    layer_size_trunk = [32, 32]
    B, N = 8, 200  # N not a multiple of 128 -> exercises pad-to-128 + slice path

    key, kb, kt, kxb, kxt = jax.random.split(key, 5)
    branch_params = init_fnn_params(kb, layer_size_branch, in_d_branch, mid_d)
    trunk_params = init_fnn_params(kt, layer_size_trunk, in_d_trunk, mid_d)
    # Module initializes self.b = zeros(1); nonzero here to exercise the SMEM bias path.
    b0 = jnp.full((1,), 0.25, jnp.float32)

    x_branch = jax.random.normal(kxb, (B, in_d_branch), jnp.float32)
    x_trunk = jax.random.normal(kxt, (N, in_d_trunk), jnp.float32)

    y = jax.block_until_ready(
        deeponet_forward(x_branch, x_trunk, branch_params, trunk_params, b0))
    y_ref = _ref_deeponet(x_branch, x_trunk, branch_params, trunk_params, b0)
    assert y.shape == (B, N)
    assert jnp.allclose(y, y_ref, atol=1e-4, rtol=1e-4), "mismatch vs reference"

    # Multi-tile path (grid > 1, lane-dense 128-wide tiles).
    N2 = 640
    x_trunk2 = jax.random.normal(jax.random.PRNGKey(1), (N2, in_d_trunk), jnp.float32)
    y2 = jax.block_until_ready(
        deeponet_forward(x_branch, x_trunk2, branch_params, trunk_params, b0))
    y2_ref = _ref_deeponet(x_branch, x_trunk2, branch_params, trunk_params, b0)
    assert jnp.allclose(y2, y2_ref, atol=1e-4, rtol=1e-4), "multi-tile mismatch"

    # Small-N path (pads 8 -> 128, single grid step).
    x_trunk_small = x_trunk[:8]
    y_small = jax.block_until_ready(
        deeponet_forward(x_branch, x_trunk_small, branch_params, trunk_params, b0))
    y_small_ref = _ref_deeponet(x_branch, x_trunk_small, branch_params, trunk_params, b0)
    assert jnp.allclose(y_small, y_small_ref, atol=1e-4, rtol=1e-4), "small-N mismatch"

    print("KERNEL_OK")
</pallas_src>

<mosaic_0001>
module attributes {stable_mosaic.version = 11 : i64} {
  func.func @_deeponet_kernel(%arg0: i32, %arg1: memref<8x32xf32, #tpu.memory_space<vmem>>, %arg2: memref<2x128xf32, #tpu.memory_space<vmem>>, %arg3: memref<32x2xf32, #tpu.memory_space<vmem>>, %arg4: memref<32x1xf32, #tpu.memory_space<vmem>>, %arg5: memref<32x32xf32, #tpu.memory_space<vmem>>, %arg6: memref<32x1xf32, #tpu.memory_space<vmem>>, %arg7: memref<32x32xf32, #tpu.memory_space<vmem>>, %arg8: memref<32x1xf32, #tpu.memory_space<vmem>>, %arg9: memref<1xf32, #tpu.memory_space<smem>>, %arg10: memref<8x128xf32, #tpu.memory_space<vmem>>) attributes {dimension_semantics = [#tpu.dimension_semantics<parallel>], iteration_bounds = array<i64: 2>, scalar_prefetch = 0 : i64, scratch_operands = 0 : i64, tpu.core_type = #tpu.core_type<tc>, window_params = [{pipeline_mode = #tpu.pipeline_mode<synchronous>, transform_indices = @transform_0, window_bounds = array<i64: 8, 32>}, {transform_indices = @transform_1, window_bounds = array<i64: 2, 128>}, {pipeline_mode = #tpu.pipeline_mode<synchronous>, transform_indices = @transform_2, window_bounds = array<i64: 32, 2>}, {pipeline_mode = #tpu.pipeline_mode<synchronous>, transform_indices = @transform_3, window_bounds = array<i64: 32, 1>}, {pipeline_mode = #tpu.pipeline_mode<synchronous>, transform_indices = @transform_4, window_bounds = array<i64: 32, 32>}, {pipeline_mode = #tpu.pipeline_mode<synchronous>, transform_indices = @transform_5, window_bounds = array<i64: 32, 1>}, {pipeline_mode = #tpu.pipeline_mode<synchronous>, transform_indices = @transform_6, window_bounds = array<i64: 32, 32>}, {pipeline_mode = #tpu.pipeline_mode<synchronous>, transform_indices = @transform_7, window_bounds = array<i64: 32, 1>}, {transform_indices = @transform_8, window_bounds = array<i64: 1>}, {transform_indices = @transform_9, window_bounds = array<i64: 8, 128>}]} {
    %c0 = arith.constant 0 : index
    %c0_0 = arith.constant 0 : index
    %0 = vector.load %arg2[%c0, %c0_0] : memref<2x128xf32, #tpu.memory_space<vmem>>, vector<2x128xf32>
    %c0_1 = arith.constant 0 : index
    %c0_2 = arith.constant 0 : index
    %1 = vector.load %arg3[%c0_1, %c0_2] : memref<32x2xf32, #tpu.memory_space<vmem>>, vector<32x2xf32>
    %c0_3 = arith.constant 0 : index
    %c0_4 = arith.constant 0 : index
    %2 = vector.load %arg4[%c0_3, %c0_4] : memref<32x1xf32, #tpu.memory_space<vmem>>, vector<32x1xf32>
    %3 = vector.extract_strided_slice %1 {offsets = [0, 0], sizes = [32, 1], strides = [1, 1]} : vector<32x2xf32> to vector<32x1xf32>
    %4 = vector.extract_strided_slice %0 {offsets = [0, 0], sizes = [1, 128], strides = [1, 1]} : vector<2x128xf32> to vector<1x128xf32>
    %5 = vector.broadcast %3 : vector<32x1xf32> to vector<32x128xf32>
    %6 = vector.broadcast %4 : vector<1x128xf32> to vector<32x128xf32>
    %7 = arith.mulf %5, %6 : vector<32x128xf32>
    %8 = vector.extract_strided_slice %1 {offsets = [0, 1], sizes = [32, 1], strides = [1, 1]} : vector<32x2xf32> to vector<32x1xf32>
    %9 = vector.extract_strided_slice %0 {offsets = [1, 0], sizes = [1, 128], strides = [1, 1]} : vector<2x128xf32> to vector<1x128xf32>
    %10 = vector.broadcast %8 : vector<32x1xf32> to vector<32x128xf32>
    %11 = vector.broadcast %9 : vector<1x128xf32> to vector<32x128xf32>
    %12 = arith.mulf %10, %11 : vector<32x128xf32>
    %13 = arith.addf %7, %12 : vector<32x128xf32>
    %14 = vector.broadcast %2 : vector<32x1xf32> to vector<32x128xf32>
    %15 = arith.addf %13, %14 : vector<32x128xf32>
    %16 = math.tanh %15 : vector<32x128xf32>
    %c0_5 = arith.constant 0 : index
    %c0_6 = arith.constant 0 : index
    %17 = vector.load %arg5[%c0_5, %c0_6] : memref<32x32xf32, #tpu.memory_space<vmem>>, vector<32x32xf32>
    %c0_7 = arith.constant 0 : index
    %c0_8 = arith.constant 0 : index
    %18 = vector.load %arg6[%c0_7, %c0_8] : memref<32x1xf32, #tpu.memory_space<vmem>>, vector<32x1xf32>
    %cst = arith.constant dense<0.000000e+00> : vector<32x128xf32>
    %19 = tpu.matmul %17, %16, %cst {dimension_numbers = #tpu.dot_dimension_numbers<[1], [0], [0], [1], [0, 0, 1, 1], [], []>} : vector<32x32xf32>, vector<32x128xf32>, vector<32x128xf32> -> vector<32x128xf32>
    %20 = vector.broadcast %18 : vector<32x1xf32> to vector<32x128xf32>
    %21 = arith.addf %19, %20 : vector<32x128xf32>
    %22 = math.tanh %21 : vector<32x128xf32>
    %c0_9 = arith.constant 0 : index
    %c0_10 = arith.constant 0 : index
    %23 = vector.load %arg7[%c0_9, %c0_10] : memref<32x32xf32, #tpu.memory_space<vmem>>, vector<32x32xf32>
    %c0_11 = arith.constant 0 : index
    %c0_12 = arith.constant 0 : index
    %24 = vector.load %arg8[%c0_11, %c0_12] : memref<32x1xf32, #tpu.memory_space<vmem>>, vector<32x1xf32>
    %cst_13 = arith.constant dense<0.000000e+00> : vector<32x128xf32>
    %25 = tpu.matmul %23, %22, %cst_13 {dimension_numbers = #tpu.dot_dimension_numbers<[1], [0], [0], [1], [0, 0, 1, 1], [], []>} : vector<32x32xf32>, vector<32x128xf32>, vector<32x128xf32> -> vector<32x128xf32>
    %26 = vector.broadcast %24 : vector<32x1xf32> to vector<32x128xf32>
    %27 = arith.addf %25, %26 : vector<32x128xf32>
    %c0_14 = arith.constant 0 : index
    %c0_15 = arith.constant 0 : index
    %28 = vector.load %arg1[%c0_14, %c0_15] : memref<8x32xf32, #tpu.memory_space<vmem>>, vector<8x32xf32>
    %cst_16 = arith.constant dense<0.000000e+00> : vector<8x128xf32>
    %29 = tpu.matmul %28, %27, %cst_16 {dimension_numbers = #tpu.dot_dimension_numbers<[1], [0], [0], [1], [0, 0, 1, 1], [], []>} : vector<8x32xf32>, vector<32x128xf32>, vector<8x128xf32> -> vector<8x128xf32>
    %c0_17 = arith.constant 0 : index
    %30 = memref.load %arg9[%c0_17] : memref<1xf32, #tpu.memory_space<smem>>
    %31 = vector.broadcast %30 : f32 to vector<8x128xf32>
    %32 = arith.addf %29, %31 : vector<8x128xf32>
    %c0_18 = arith.constant 0 : index
    %c0_19 = arith.constant 0 : index
    %33 = vector.load %arg10[%c0_18, %c0_19] : memref<8x128xf32, #tpu.memory_space<vmem>>, vector<8x128xf32>
    tpu.vector_store %arg10[%c0_18, %c0_19], %32 {strides = array<i32>} : memref<8x128xf32, #tpu.memory_space<vmem>>, vector<8x128xf32>,
    return
  }
  func.func @transform_0(%arg0: i32) -> (i32, i32) {
    %c0_i32 = arith.constant 0 : i32
    %c0_i32_0 = arith.constant 0 : i32
    %c0_i32_1 = arith.constant 0 : i32
    return %c0_i32, %c0_i32_0 : i32, i32
  }
  func.func @transform_1(%arg0: i32) -> (i32, i32) {
    %c0_i32 = arith.constant 0 : i32
    %c0_i32_0 = arith.constant 0 : i32
    return %c0_i32, %arg0 : i32, i32
  }
  func.func @transform_2(%arg0: i32) -> (i32, i32) {
    %c0_i32 = arith.constant 0 : i32
    %c0_i32_0 = arith.constant 0 : i32
    %c0_i32_1 = arith.constant 0 : i32
    return %c0_i32, %c0_i32_0 : i32, i32
  }
  func.func @transform_3(%arg0: i32) -> (i32, i32) {
    %c0_i32 = arith.constant 0 : i32
    %c0_i32_0 = arith.constant 0 : i32
    %c0_i32_1 = arith.constant 0 : i32
    return %c0_i32, %c0_i32_0 : i32, i32
  }
  func.func @transform_4(%arg0: i32) -> (i32, i32) {
    %c0_i32 = arith.constant 0 : i32
    %c0_i32_0 = arith.constant 0 : i32
    %c0_i32_1 = arith.constant 0 : i32
    return %c0_i32, %c0_i32_0 : i32, i32
  }
  func.func @transform_5(%arg0: i32) -> (i32, i32) {
    %c0_i32 = arith.constant 0 : i32
    %c0_i32_0 = arith.constant 0 : i32
    %c0_i32_1 = arith.constant 0 : i32
    return %c0_i32, %c0_i32_0 : i32, i32
  }
  func.func @transform_6(%arg0: i32) -> (i32, i32) {
    %c0_i32 = arith.constant 0 : i32
    %c0_i32_0 = arith.constant 0 : i32
    %c0_i32_1 = arith.constant 0 : i32
    return %c0_i32, %c0_i32_0 : i32, i32
  }
  func.func @transform_7(%arg0: i32) -> (i32, i32) {
    %c0_i32 = arith.constant 0 : i32
    %c0_i32_0 = arith.constant 0 : i32
    %c0_i32_1 = arith.constant 0 : i32
    return %c0_i32, %c0_i32_0 : i32, i32
  }
  func.func @transform_8(%arg0: i32) -> i32 {
    %c0_i32 = arith.constant 0 : i32
    %c0_i32_0 = arith.constant 0 : i32
    return %c0_i32 : i32
  }
  func.func @transform_9(%arg0: i32) -> (i32, i32) {
    %c0_i32 = arith.constant 0 : i32
    %c0_i32_0 = arith.constant 0 : i32
    return %c0_i32, %arg0 : i32, i32
  }
}

</mosaic_0001>

<bundles_post_ra>
// kernel: tpu_custom_call.1
= control target key start
LH: loop header
LB: loop body
LE: loop exit
PB: predicated region body
PF: predicated region fallthrough
CT: control target
= control target key end

     0   :  { %s1269_s0 = inlined_call_operand.vmem [shape: f32[8,32], index: 0, kind: input, shape index: {}]   ;;  %s1270_s1 = inlined_call_operand.vmem [shape: f32[2,256], index: 1, kind: input, shape index: {}]   ;;  %s1271_s2 = inlined_call_operand.vmem [shape: f32[32,2], index: 2, kind: input, shape index: {}]   ;;  %s1272_s3 = inlined_call_operand.vmem [shape: f32[32,1], index: 3, kind: input, shape index: {}]   ;;  %s1273_s4 = inlined_call_operand.vmem [shape: f32[32,32], index: 4, kind: input, shape index: {}]   ;;  %s1274_s5 = inlined_call_operand.vmem [shape: f32[32,1], index: 5, kind: input, shape index: {}]   ;;  %s1275_s6 = inlined_call_operand.vmem [shape: f32[32,32], index: 6, kind: input, shape index: {}]   ;;  %s1276_s7 = inlined_call_operand.vmem [shape: f32[32,1], index: 7, kind: input, shape index: {}]   ;;  %s1277_s8 = inlined_call_operand.<no memory space> [shape: f32[1], index: 8, kind: input, shape index: {}]   ;;  %s1278_s9 = inlined_call_operand.hbm [shape: f32[8,256], index: 9, kind: output, shape index: {}]  }
   0x1   :  { %14 = sst [smem:[#allocation2]] %s1277_s8 }
   0x2   :  { %15 = vsyncpa [#allocation4], 0 }
   0x3   :  { %17 = vsyncpa [#allocation4 + $0x1], 0  ;;  %s1092_s11 = smov 0   ;;  %s1094_s12 = smov 0  }
   0x4   :  { %s1096_s13 = smov 0   ;;  %s1098_s14 = smov 0  }
   0x5 LB: > { %s1113_s8 = sadd.s32 4294967295, %s1032_s14   ;;  %s827_s15 = sadd.s32 4294967294, %s1032_s14   ;;  %s1032_s14 = sphi %s1098_s14, %s1284_s14   ;;  %s1028_s13 = sphi %s1096_s13, %s1283_s13   ;;  %s1024_s12 = sphi %s1094_s12, %s1282_s12   ;;  %s1020_s11 = sphi %s1092_s11, %s1281_s11  }
   0x6   : > { %s1117_s16 = sadd.s32 1, %s1032_s14   ;;  %s224_s17 = sadd.s32 1, %s1028_s13 }
   0x7   : > { %s221_s18 = ssub.s32 %s1032_s14, %s1117_s16  ;;  %p234_p0 = scmp.ne.s32.totalorder %s1028_s13, %s1024_s12 }
   0x8   : > { %p222_p1 = scmp.eq.s32.totalorder %s221_s18, 0  ;;  %p235_p2 = scmp.eq.s32.totalorder %s1113_s8, 1 }
   0x9   : > { %p240_p3 = scmp.ne.s32.totalorder %s1024_s12, %s1020_s11  ;;  %p241_p4 = scmp.eq.s32.totalorder %s827_s15, 1 }
   0xa   : > { %s1128_s19 = scalar_select %p222_p1, %s1028_s13, %s224_s17  }
   0xb   : > { %p1130_p5 = por %p235_p2, %p234_p0  ;;  %p1134_p6 = por %p241_p4, %p240_p3 }
   0xc   : > { %p830_p7 = scmp.ge.s32.totalorder %s1032_s14, 1  ;;  %p290_p8 = scmp.lt.s32.totalorder %s1032_s14, 3 }
   0xe   : > { %p291_p9 = pnand %p830_p7, %p290_p8 }
   0xf   : > { %p325_p10 = scmp.lt.s32.totalorder (!%p291_p9), %s1113_s8, 1  ;;  %s322_s25 = sand.u32 (!%p291_p9), 1, %s1024_s12  }
  0x10   : > { %294 = sbr.rel (%p291_p9) target bundleno = 828 (0x33c), region = 56  ;;  %s678_s26 = sld [smem:[#allocation2]] (!%p291_p9) }
  0x11   : > { %s831_s27 = sshll.u32 (!%p291_p9), %s322_s25, 3  ;;  %s843_s28 = sshll.u32 (!%p291_p9), %s1113_s8, 7 }
  0x12   : > { %s324_s29 = scalar_lea.vmem (!%p291_p9), [#allocation3], %s831_s27  ;;  %s1234_s17 = scalar_lea.hbm (!%p291_p9), %s1278_s9, %s843_s28 }
  0x13   : > { %s1038_s23 = smov (!%p291_p9), [#allocation3]  }
  0x15   : > { %v333_v0 = vld [vmem:[%s1271_s2 + $0x18] sm:$0xff]  ;;  %v332_v1 = vld [vmem:[%s1271_s2 + $0x10] sm:$0xff]  ;;  %v1034_v2 = vmov 1   ;;  %v1035_v3 = vmov 0   ;;  %v331_v4 = vld [vmem:[%s1271_s2 + $0x8] sm:$0xff]  ;;  %vm450_vm0 = vcmask 261120   ;;  %v358_v19 = vlaneseq }
  0x16   : > { %949 = vset.pattern.permute.xlu0 %v1034_v2  ;;  %950 = vset.pattern.permute.xlu1 %v1035_v3  ;;  %v330_v5 = vld [vmem:[%s1271_s2] sm:$0xff]  ;;  %v337_v6 = vld [vmem:[%s1272_s3 + $0x18] sm:$0xff]  ;;  %v335_v7 = vld [vmem:[%s1272_s3 + $0x8] sm:$0xff]  ;;  %s326_s30 = scalar_select %p325_p10, %s1113_s8, 1  ;;  %vm1037_vm1 = vmmov 0  }
  0x17   : > { %379 = vperm.xlu0 %949, %v333_v0   ;;  %350 = vperm.xlu1 %950, %v332_v1   ;;  %v429_v8 = vld [vmem:[%s1274_s5 + $0x18] sm:$0xff]  ;;  %v336_v9 = vld [vmem:[%s1272_s3 + $0x10] sm:$0xff]  ;;  %v427_v10 = vld [vmem:[%s1274_s5 + $0x8] sm:$0xff]  ;;  %v359_v20 = vshrl.u32 %v358_v19, 7  ;;  %s976_s8 = sshll.u32 %s1038_s23, 4  ;;  %s977_s8 = int_to_ptr.vmem [resolvable:$false] %s976_s8 }
  0x18   : > { %v334_v11 = vld [vmem:[%s1272_s3] sm:$0xff]  ;;  %v559_v12 = vld [vmem:[%s1276_s7 + $0x18] sm:$0xff]  ;;  %v428_v13 = vld [vmem:[%s1274_s5 + $0x10] sm:$0xff]  ;;  %s832_s10 = sshll.u32 %s326_s30, 1  ;;  %s768_s30 = sshll.u32 %s324_s29, 4  ;;  %s769_s30 = int_to_ptr.vmem [resolvable:$true] %s768_s30 }
  0x19   : > { %v557_v14 = vld [vmem:[%s1276_s7 + $0x8] sm:$0xff]  ;;  %v426_v15 = vld [vmem:[%s1274_s5] sm:$0xff]  ;;  %v558_v16 = vld [vmem:[%s1276_s7 + $0x10] sm:$0xff]  ;;  %s328_s18 = scalar_lea.vmem %s1270_s1, %s832_s10  ;;  %v384_v23 = vsub.s32 1, %v359_v20  ;;  %v360_v24 = vsub.s32 0, %v359_v20  ;;  %s972_s22 = scalar_lea.vmem %s769_s30, 128 }
  0x1a   : > { %v422_v17 = vld [vmem:[%s1273_s4] sm:$0xff]  ;;  %v423_v58 = vld [vmem:[%s1273_s4 + $0x8] sm:$0xff]  ;;  %v424_v59 = vld [vmem:[%s1273_s4 + $0x10] sm:$0xff]  ;;  %p973_p11 = scmp.ne.s32.totalorder %s769_s30, %s972_s22  ;;  %s978_s24 = scalar_lea.vmem %s977_s8, 256 }
  0x1b   : > { %951 = vset.pattern.permute.xlu1 %v1034_v2  ;;  %371 = vperm.xlu0 %949, %v331_v4   ;;  %v556_v18 = vld [vmem:[%s1276_s7] sm:$0xff]  ;;  %v425_v60 = vld [vmem:[%s1273_s4 + $0x18] sm:$0xff]  ;;  %p979_p0 = scmp.lt.s32.totalorder %s769_s30, %s977_s8  ;;  %p980_p1 = scmp.lt.s32.totalorder %s978_s24, %s972_s22 }
  0x1c   : > { %375 = vperm.xlu1 %951, %v332_v1   ;;  %875 = vmatprep.mubr.msk.f32.mxu0 %vm450_vm0, %v422_v17  ;;  %v329_v26 = vld [vmem:[%s328_s18] sm:$0x3]  ;;  %v1036_v17 = vmov 0.0   ;;  %s755_s18 = scalar_lea.sflag [#allocation4], %s322_s25  ;;  %p974_p12 = pnand %p973_p11, %p1130_p5 }
  0x1d   : > { %v385_v28 = vrot.slane %v329_v26, %v384_v23  ;;  %v361_v29 = vrot.slane %v329_v26, %v360_v24  ;;  %v552_v61 = vld [vmem:[%s1275_s6] sm:$0xff]  ;;  %p981_p2 = por %p980_p1, %p979_p0 }
  0x1e   : > { %889 = vmatprep.mubr.msk.f32.mxu1 %vm450_vm0, %v552_v61  ;;  %p975_p13 = pneg %p974_p12 }
  0x1f   : > { %953 = vset.pattern.permute.xlu0 %v1035_v3 }
  0x20   : > { %952 = vset.pattern.permute.xlu1 %v1035_v3  ;;  %355 = vperm.xlu0 %953, %v333_v0   ;;  %p982_p3 = pnand %p981_p2, %p975_p13 }
  0x21   : > { %345 = vperm.xlu1 %952, %v331_v4  }
  0x24   : > { %340 = vperm.xlu0 %953, %v330_v5  }
  0x25   : > { %411 = vperm.xlu1 %952, %v337_v6  }
  0x28   : > { %401 = vperm.xlu0 %953, %v335_v7  }
  0x29   : > { %954 = vset.pattern.permute.xlu1 %v1034_v2 }
  0x2a   : > { %367 = vperm.xlu1 %954, %v330_v5  }
  0x2c   : > { %447 = vperm.xlu0 %953, %v429_v8  }
  0x2e   : > { %955 = vset.pattern.permute.xlu1 %v1035_v3 }
  0x2f   : > { %406 = vperm.xlu1 %955, %v336_v9  }
  0x30   : > { %437 = vperm.xlu0 %953, %v427_v10  }
  0x33   : > { %396 = vperm.xlu1 %955, %v334_v11  }
  0x34   : > { %577 = vperm.xlu0 %953, %v559_v12  }
  0x37   : > { %442 = vperm.xlu1 %955, %v428_v13  }
  0x38   : > { %567 = vperm.xlu0 %953, %v557_v14   ;;  %v553_v14 = vld [vmem:[%s1275_s6 + $0x8] sm:$0xff] }
  0x3b   : > { %432 = vperm.xlu1 %955, %v426_v15   ;;  %v554_v15 = vld [vmem:[%s1275_s6 + $0x10] sm:$0xff] }
  0x3f   : > { %572 = vperm.xlu1 %955, %v558_v16   ;;  %v555_v16 = vld [vmem:[%s1275_s6 + $0x18] sm:$0xff] }
  0x43   : > { %562 = vperm.xlu1 %955, %v556_v18  }
  0x92   : > { %v351_v21 = vpop.permute.xlu1 %350  ;;  %v380_v22 = vpop.permute.xlu0 %379 }
  0x93   : > { %v389_v30 = vmul.f32 %v385_v28, %v380_v22  ;;  %v364_v42 = vmul.f32 %v361_v29, %v351_v21 }
  0x96   : > { %v372_v25 = vpop.permute.xlu0 %371 }
  0x97   : > { %v376_v27 = vpop.permute.xlu1 %375  ;;  %v387_v39 = vmul.f32 %v385_v28, %v372_v25 }
  0x98   : > { %v388_v38 = vmul.f32 %v385_v28, %v376_v27 }
  0x9a   : > { %v392_v47 = vadd.f32 %v388_v38, %v364_v42 }
  0x9b   : > { %v356_v31 = vpop.permute.xlu0 %355 }
  0x9c   : > { %v365_v32 = vmul.f32 %v361_v29, %v356_v31  ;;  %v346_v33 = vpop.permute.xlu1 %345  ;;  %v679_v31 = vstv %s678_s26 }
  0x9d   : > { %v363_v40 = vmul.f32 %v361_v29, %v346_v33 }
  0x9e   : > { %v393_v34 = vadd.f32 %v389_v30, %v365_v32  ;;  %v677_v30 = vld [vmem:[%s1269_s0] sm:$0xff] }
  0x9f   : > { %v341_v37 = vpop.permute.xlu0 %340  ;;  %v391_v45 = vadd.f32 %v387_v39, %v363_v40 }
  0xa0   : > { %v412_v35 = vpop.permute.xlu1 %411  ;;  %v362_v44 = vmul.f32 %v361_v29, %v341_v37 }
  0xa1   : > { %v417_v36 = vadd.f32 %v412_v35, %v393_v34 }
  0xa3   : > { %956 = vtanh.f32 %v417_v36  ;;  %v402_v43 = vpop.permute.xlu0 %401 }
  0xa4   : > { %v415_v49 = vadd.f32 %v402_v43, %v391_v45 }
  0xa5   : > { %v368_v41 = vpop.permute.xlu1 %367 }
  0xa6   : > { %v386_v46 = vmul.f32 %v385_v28, %v368_v41 }
  0xa7   : > { %v448_v62 = vpop.permute.xlu0 %447 }
  0xa8   : > { %v390_v51 = vadd.f32 %v386_v46, %v362_v44 }
  0xaa   : > { %v407_v48 = vpop.permute.xlu1 %406 }
  0xab   : > { %v416_v50 = vadd.f32 %v407_v48, %v392_v47  ;;  %v438_v4 = vpop.permute.xlu0 %437 }
  0xad   : > { %958 = vtanh.f32 %v416_v50 }
  0xae   : > { %v397_v52 = vpop.permute.xlu1 %396  ;;  %960 = vtanh.f32 %v415_v49 }
  0xaf   : > { %v414_v53 = vadd.f32 %v397_v52, %v390_v51  ;;  %v578_v19 = vpop.permute.xlu0 %577 }
  0xb0   : > { %v957_v54 = vpop.eup %956 }
  0xb1   : > { %962 = vtanh.f32 %v414_v53  ;;  %867 = vmatprep.subr.mxu0 %v957_v54 }
  0xb2   : > { %868 = vmatpush3.msra.mxu0 %v957_v54  ;;  %v443_v0 = vpop.permute.xlu1 %442 }
  0xb3   : > { %v568_v26 = vpop.permute.xlu0 %567 }
  0xb6   : > { %v433_v8 = vpop.permute.xlu1 %432 }
  0xba   : > { %v959_v55 = vpop.eup %958  ;;  %v573_v21 = vpop.permute.xlu1 %572 }
  0xbb   : > { %869 = vmatprep.subr.mxu0 %v959_v55  ;;  %v961_v56 = vpop.eup %960 }
  0xbc   : > { %870 = vmatpush3.msra.mxu0 %v959_v55 }
  0xbd   : > { %871 = vmatprep.subr.mxu0 %v961_v56 }
  0xbe   : > { %v963_v57 = vpop.eup %962  ;;  %872 = vmatpush3.msra.mxu0 %v961_v56  ;;  %v563_v28 = vpop.permute.xlu1 %562 }
  0xbf   : > { %873 = vmatprep.subr.mxu0 %v963_v57 }
  0xc0   : > { %874 = vmatpush3.msra.mxu0 %v963_v57 }
  0xc1   : > { %876 = vmatmul.mubr.msk.f32.vlgmr.msra.gmra.mxu0 %vm450_vm0, %v423_v58  ;;  %895 = vmatprep.subr.mxu0 %v1036_v17 }
  0xc2   : > { %878 = vmatprep.mubr.msk.f32.mxu0 %vm450_vm0, %v424_v59 }
  0xc5   : > { %879 = vmatmul.mubr.msk.f32.gmra.mxu0 %vm450_vm0, %v425_v60 }
  0xc6   : > { %903 = vmatprep.mubr.msk.f32.mxu0 %vm1037_vm1, %v1036_v17 }
 0x181   : > { %v877_v63 = vpop.f32.mrf.mxu0 }
 0x182   : > { %v535_v6 = vadd.f32 %v877_v63, %v438_v4 }
 0x183   : > { %v529_v1 = vpop.f32.mrf.mxu0 }
 0x184   : > { %v530_v9 = vadd.f32 %v529_v1, %v433_v8 }
 0x185   : > { %v880_v2 = vpop.f32.mrf.mxu0 }
 0x186   : > { %v545_v3 = vadd.f32 %v880_v2, %v448_v62 }
 0x187   : > { %v539_v5 = vpop.f32.mrf.mxu0 }
 0x188   : > { %964 = vtanh.f32 %v545_v3  ;;  %v540_v7 = vadd.f32 %v539_v5, %v443_v0 }
 0x18a   : > { %966 = vtanh.f32 %v540_v7 }
 0x18b   : > { %968 = vtanh.f32 %v535_v6 }
 0x18c   : > { %970 = vtanh.f32 %v530_v9 }
 0x195   : > { %v965_v10 = vpop.eup %964 }
 0x196   : > { %881 = vmatprep.subr.mxu1 %v965_v10 }
 0x197   : > { %v967_v11 = vpop.eup %966  ;;  %882 = vmatpush3.msra.mxu1 %v965_v10 }
 0x198   : > { %883 = vmatprep.subr.mxu1 %v967_v11  ;;  %v969_v12 = vpop.eup %968 }
 0x199   : > { %884 = vmatpush3.msra.mxu1 %v967_v11  ;;  %v971_v13 = vpop.eup %970 }
 0x19a   : > { %885 = vmatprep.subr.mxu1 %v969_v12 }
 0x19b   : > { %886 = vmatpush3.msra.mxu1 %v969_v12 }
 0x19c   : > { %887 = vmatprep.subr.mxu1 %v971_v13 }
 0x19d   : > { %888 = vmatpush3.msra.mxu1 %v971_v13 }
 0x19e   : > { %890 = vmatmul.mubr.msk.f32.vlgmr.msra.gmra.mxu1 %vm450_vm0, %v553_v14 }
 0x19f   : > { %892 = vmatprep.mubr.msk.f32.mxu1 %vm450_vm0, %v554_v15 }
 0x1a2   : > { %893 = vmatmul.mubr.msk.f32.gmra.mxu1 %vm450_vm0, %v555_v16 }
 0x25e   : > { %v891_v18 = vpop.f32.mrf.mxu1 }
 0x25f   : > { %v664_v27 = vadd.f32 %v891_v18, %v568_v26 }
 0x260   : > { %v658_v20 = vpop.f32.mrf.mxu1 }
 0x261   : > { %v659_v29 = vadd.f32 %v658_v20, %v563_v28 }
 0x262   : > { %v894_v22 = vpop.f32.mrf.mxu1 }
 0x263   : > { %v674_v23 = vadd.f32 %v894_v22, %v578_v19 }
 0x264   : > { %v668_v24 = vpop.f32.mrf.mxu1 }
 0x265   : > { %v669_v25 = vadd.f32 %v668_v24, %v573_v21  ;;  %896 = vmatpush3.msra.mxu0 %v674_v23 }
 0x266   : > { %897 = vmatprep.subr.mxu0 %v1036_v17 }
 0x267   : > { %898 = vmatpush3.msra.mxu0 %v669_v25 }
 0x268   : > { %899 = vmatprep.subr.mxu0 %v1036_v17 }
 0x269   : > { %900 = vmatpush3.msra.mxu0 %v664_v27 }
 0x26a   : > { %901 = vmatprep.subr.mxu0 %v1036_v17 }
 0x26b   : > { %902 = vmatpush3.msra.mxu0 %v659_v29 }
 0x26c   : > { %904 = vmatmul.mubr.msk.f32.vlgmr.msra.gmra.mxu0 %vm450_vm0, %v677_v30 }
 0x32c   : > { %v749_v32 = vpop.f32.mrf.mxu0 }
 0x32d   : > { %v750_v33 = vadd.f32 %v749_v32, %v679_v31 }
 0x32e   : > { %v905_v34 = vpop.f32.mrf.mxu0 }
 0x32f   : > { %753 = vst [vmem:[%s324_s29] sm:$0xff] %v750_v33 }
 0x330   : > { %985 = shalt.err (!%p982_p3)
}
 0x331   : > { %s986_s26 = scalar_lea.hbm %s1234_s17, 128  ;;  %s990_s28 = scalar_lea.hbm %s1278_s9, 256 }
 0x332   : > { %p987_p4 = scmp.ne.s32.totalorder %s1234_s17, %s986_s26  ;;  %p991_p9 = scmp.lt.s32.totalorder %s1234_s17, %s1278_s9 }
 0x333   : > { %p992_p10 = scmp.lt.s32.totalorder %s990_s28, %s986_s26 }
 0x334   : > { %p988_p7 = pnand %p987_p4, %p1130_p5 }
 0x335   : > { %p993_p11 = por %p992_p10, %p991_p9 }
 0x336   : > { %p989_p8 = pneg %p988_p7 }
 0x338   : > { %p994_p12 = pnand %p993_p11, %p989_p8 }
 0x33a   : > { %997 = shalt.err (!%p994_p12)
}
 0x33b   : > { %906 = dma.vmem_to_hbm [thread:$0]  (%p1130_p5), %s769_s30, 128, %s1234_s17, %s755_s18  }
 0x33c PF: > { %p912_p13 = scmp.ge.s32.totalorder %s1032_s14, 2  ;;  %s780_s15 = sand.u32 1, %s1020_s11  }
 0x33d   : > { %s781_s22 = scalar_lea.sflag [#allocation4], %s780_s15 }
 0x33e   : > { %p909_p0 = pnand %p912_p13, %p1134_p6 }
 0x340   : > { %p910_p1 = pneg %p909_p0 }
 0x342   : > { %1015 = dma.done.wait (%p910_p1), %s781_s22, 128  }
 0x343   : > { %1017 = vsyncadd (%p910_p1), %s781_s22, 4294967168  ;;  %p20_p2 = scmp.ge.s32.totalorder %s1117_s16, 4   ;;  %s1281_s11 = smov %s1024_s12 }
 0x344   : > { %s1282_s12 = smov %s1028_s13  ;;  %s1283_s13 = smov %s1128_s19 }
 0x345   : > { %s1284_s14 = smov %s1117_s16  ;;  %22 = sbr.rel (!%p20_p2) target bundleno = 5 (0x5), region = 91 }
 0x34a   :  { %786 = vsyncpa [#allocation4], 1 }
 0x34b   :  { %788 = vsyncpa [#allocation4 + $0x1], 1 }

</bundles_post_ra>
